<compile_context>
chip_gen: v6e
topology: v6e:2x2x1
jax: 0.10.0
libtpu: 0.0.40
codegen_flags: <defaults>
</compile_context>

<pallas_src>
from functools import partial

import jax
import jax.numpy as jnp
import numpy as np
from jax.experimental import pallas as pl
from jax.experimental.pallas import tpu as pltpu


def _outconv_kernel(x_ref, w_ref, b_ref, o_ref):
    # x_ref: (1, Cin, thw)  w_ref: (Cout, Cin)  b_ref: (Cout, 1)  o_ref: (1, Cout, thw)
    x = x_ref[0]                                                       # (Cin, thw)
    acc = jnp.dot(w_ref[...], x, preferred_element_type=jnp.float32)   # (Cout, thw) f32
    o_ref[0] = (acc + b_ref[...]).astype(o_ref.dtype)                  # fused bias, cast once


def _tile_and_vmem(hw, cin, cout, itemsize):
    """Pick the H*W (lane-axis) tile and a matching VMEM limit."""
    # Per-column VMEM footprint: double-buffered input + output DMA tiles plus the
    # f32 accumulator / epilogue temporary inside the kernel body.
    per_col = 2 * (cin + cout) * itemsize + 2 * 4 * cout
    if hw <= 128:
        thw = hw                                       # full-extent block (always legal)
    else:
        cap = (16 * 1024 * 1024) // per_col            # keep pipelined tiles ~<= 16 MiB
        cap = max(128, (cap // 128) * 128)
        thw = min((hw // 128) * 128, cap)              # multiple of 128 on the lane axis
    vmem_limit = int(min(48 * 1024 * 1024,
                         max(per_col * thw + (2 << 20), 16 * 1024 * 1024)))
    return thw, vmem_limit


@partial(jax.jit, static_argnames=("tile_hw",))
def outconv_pallas(x_nchw, weight, bias, *, tile_hw=None):
    """OutConv.forward: 1x1 Conv2d.  x_nchw: (N,Cin,H,W); weight: (Cout,Cin,1,1); bias: (Cout,)."""
    N, Cin, H, W = x_nchw.shape
    Cout = weight.shape[0]
    HW = H * W

    x3 = x_nchw.reshape(N, Cin, HW)                        # contiguous view, no transpose
    w2 = weight.reshape(Cout, Cin).astype(x_nchw.dtype)    # MXU operand in activation dtype
    b2 = bias.reshape(Cout, 1).astype(jnp.float32)         # added in f32 accumulation

    itemsize = jnp.dtype(x_nchw.dtype).itemsize
    thw, vmem_limit = _tile_and_vmem(HW, Cin, Cout, itemsize)
    if tile_hw is not None:
        thw = tile_hw
    grid = (N, pl.cdiv(HW, thw))                           # ragged tail handled by Pallas

    out3 = pl.pallas_call(
        _outconv_kernel,
        out_shape=jax.ShapeDtypeStruct((N, Cout, HW), x_nchw.dtype),
        grid_spec=pltpu.PrefetchScalarGridSpec(
            num_scalar_prefetch=0,
            grid=grid,
            in_specs=[
                pl.BlockSpec((1, Cin, thw), lambda n, j: (n, 0, j)),  # activation tile
                pl.BlockSpec((Cout, Cin), lambda n, j: (0, 0)),       # weight (VMEM resident)
                pl.BlockSpec((Cout, 1), lambda n, j: (0, 0)),         # bias (VMEM resident)
            ],
            out_specs=pl.BlockSpec((1, Cout, thw), lambda n, j: (n, 0, j)),
        ),
        compiler_params=pltpu.CompilerParams(
            dimension_semantics=("parallel", "parallel"),   # independent steps -> megacore OK
            vmem_limit_bytes=vmem_limit,                    # footprint-based, capped << v7x 64 MiB
        ),
    )(x3, w2, b2)

    return out3.reshape(N, Cout, H, W)                      # contiguous view, no transpose


def outconv_reference(x_nchw, weight, bias):
    """Pure-JAX reference with identical semantics (for verification)."""
    y = jax.lax.conv_general_dilated(
        x_nchw.astype(jnp.float32), weight.astype(jnp.float32),
        window_strides=(1, 1), padding="VALID",
        dimension_numbers=("NCHW", "OIHW", "NCHW"))
    return y + bias.reshape(1, -1, 1, 1)


if __name__ == "__main__":
    key = jax.random.PRNGKey(0)
    kx, kw, kb = jax.random.split(key, 3)

    N, C_IN, H, W, C_OUT = 2, 4, 16, 16, 8
    x = jax.random.normal(kx, (N, C_IN, H, W), jnp.float32)
    # PyTorch Conv2d parameter layout: weight (Cout, Cin, 1, 1), bias (Cout,)
    weight = 0.1 * jax.random.normal(kw, (C_OUT, C_IN, 1, 1), jnp.float32)
    bias = 0.1 * jax.random.normal(kb, (C_OUT,), jnp.float32)

    # tile_hw=128 -> grid (N=2, HW/128=2): exercises the pipelined, multi-step grid
    # at this toy shape.  Production shapes use the auto-sized large tile.
    out = outconv_pallas(x, weight, bias, tile_hw=128)
    out = jax.block_until_ready(out)

    ref = outconv_reference(x, weight, bias)
    assert out.shape == (N, C_OUT, H, W), out.shape
    max_err = float(jnp.max(jnp.abs(out.astype(jnp.float32) - ref)))
    if not np.isfinite(max_err) or max_err > 1e-4:
        raise AssertionError(f"mismatch vs reference: max abs err = {max_err}")

    print("KERNEL_OK")
</pallas_src>

<mosaic_0001>
module attributes {stable_mosaic.version = 11 : i64} {
  func.func @_outconv_kernel(%arg0: i32, %arg1: i32, %arg2: memref<1x4x128xf32, #tpu.memory_space<vmem>>, %arg3: memref<8x4xf32, #tpu.memory_space<vmem>>, %arg4: memref<8x1xf32, #tpu.memory_space<vmem>>, %arg5: memref<1x8x128xf32, #tpu.memory_space<vmem>>) attributes {dimension_semantics = [#tpu.dimension_semantics<parallel>, #tpu.dimension_semantics<parallel>], iteration_bounds = array<i64: 2, 2>, scalar_prefetch = 0 : i64, scratch_operands = 0 : i64, tpu.core_type = #tpu.core_type<tc>, window_params = [{transform_indices = @transform_0, window_bounds = array<i64: 1, 4, 128>}, {pipeline_mode = #tpu.pipeline_mode<synchronous>, transform_indices = @transform_1, window_bounds = array<i64: 8, 4>}, {pipeline_mode = #tpu.pipeline_mode<synchronous>, transform_indices = @transform_2, window_bounds = array<i64: 8, 1>}, {transform_indices = @transform_3, window_bounds = array<i64: 1, 8, 128>}]} {
    %c0 = arith.constant 0 : index
    %c0_0 = arith.constant 0 : index
    %c0_1 = arith.constant 0 : index
    %0 = vector.load %arg2[%c0, %c0_0, %c0_1] : memref<1x4x128xf32, #tpu.memory_space<vmem>>, vector<1x4x128xf32>
    %1 = vector.shape_cast %0 : vector<1x4x128xf32> to vector<4x128xf32>
    %c0_2 = arith.constant 0 : index
    %c0_3 = arith.constant 0 : index
    %2 = vector.load %arg3[%c0_2, %c0_3] : memref<8x4xf32, #tpu.memory_space<vmem>>, vector<8x4xf32>
    %cst = arith.constant dense<0.000000e+00> : vector<8x128xf32>
    %3 = tpu.matmul %2, %1, %cst {dimension_numbers = #tpu.dot_dimension_numbers<[1], [0], [0], [1], [0, 0, 1, 1], [], []>} : vector<8x4xf32>, vector<4x128xf32>, vector<8x128xf32> -> vector<8x128xf32>
    %c0_4 = arith.constant 0 : index
    %c0_5 = arith.constant 0 : index
    %4 = vector.load %arg4[%c0_4, %c0_5] : memref<8x1xf32, #tpu.memory_space<vmem>>, vector<8x1xf32>
    %5 = vector.broadcast %4 : vector<8x1xf32> to vector<8x128xf32>
    %6 = arith.addf %3, %5 : vector<8x128xf32>
    %c0_6 = arith.constant 0 : index
    %c0_7 = arith.constant 0 : index
    %c0_8 = arith.constant 0 : index
    %7 = vector.load %arg5[%c0_6, %c0_7, %c0_8] : memref<1x8x128xf32, #tpu.memory_space<vmem>>, vector<1x8x128xf32>
    %8 = vector.shape_cast %7 : vector<1x8x128xf32> to vector<8x128xf32>
    %9 = vector.shape_cast %6 : vector<8x128xf32> to vector<1x8x128xf32>
    tpu.vector_store %arg5[%c0_6, %c0_7, %c0_8], %9 {strides = array<i32>} : memref<1x8x128xf32, #tpu.memory_space<vmem>>, vector<1x8x128xf32>,
    return
  }
  func.func @transform_0(%arg0: i32, %arg1: i32) -> (i32, i32, i32) {
    %c0_i32 = arith.constant 0 : i32
    %c0_i32_0 = arith.constant 0 : i32
    return %arg0, %c0_i32, %arg1 : i32, i32, i32
  }
  func.func @transform_1(%arg0: i32, %arg1: i32) -> (i32, i32) {
    %c0_i32 = arith.constant 0 : i32
    %c0_i32_0 = arith.constant 0 : i32
    %c0_i32_1 = arith.constant 0 : i32
    return %c0_i32, %c0_i32_0 : i32, i32
  }
  func.func @transform_2(%arg0: i32, %arg1: i32) -> (i32, i32) {
    %c0_i32 = arith.constant 0 : i32
    %c0_i32_0 = arith.constant 0 : i32
    %c0_i32_1 = arith.constant 0 : i32
    return %c0_i32, %c0_i32_0 : i32, i32
  }
  func.func @transform_3(%arg0: i32, %arg1: i32) -> (i32, i32, i32) {
    %c0_i32 = arith.constant 0 : i32
    %c0_i32_0 = arith.constant 0 : i32
    return %arg0, %c0_i32, %arg1 : i32, i32, i32
  }
}

</mosaic_0001>

<bundles_post_ra>
// kernel: outconv_pallas.1
= control target key start
LH: loop header
LB: loop body
LE: loop exit
PB: predicated region body
PF: predicated region fallthrough
CT: control target
= control target key end

     0   :  { %s502_s12 = smov 0   ;;  %s504_s13 = smov 0   ;;  %s559_s0 = inlined_call_operand.vmem [shape: f32[2,4,256], index: 0, kind: input, shape index: {}]   ;;  %s560_s1 = inlined_call_operand.vmem [shape: f32[8,4], index: 1, kind: input, shape index: {}]   ;;  %s561_s2 = inlined_call_operand.vmem [shape: f32[8,1], index: 2, kind: input, shape index: {}]   ;;  %s562_s3 = inlined_call_operand.vmem [shape: f32[2,8,256], index: 3, kind: output, shape index: {}]  }
   0x1   :  { %s506_s14 = smov 0   ;;  %s508_s15 = smov 0  }
   0x2   :  { %s510_s16 = smov 0  }
   0x3 LB: > { %s22_s17 = sadd.s32 1, %s469_s14  ;;  %s25_s18 = sadd.s32 1, %s473_s15  ;;  %s477_s16 = sphi %s510_s16, %s13_s16   ;;  %s473_s15 = sphi %s508_s15, %s566_s15   ;;  %s469_s14 = sphi %s506_s14, %s565_s14   ;;  %s465_s13 = sphi %s504_s13, %s564_s13   ;;  %s461_s12 = sphi %s502_s12, %s563_s12  }
   0x4   : > { %p23_p0 = scmp.ge.s32.totalorder %s22_s17, 2  ;;  %p379_p1 = scmp.ge.s32.totalorder %s477_s16, 1 }
   0x5   : > { %p156_p2 = scmp.lt.s32.totalorder %s477_s16, 5 }
   0x6   : > { %s568_s17 = smov (%p23_p0, %s22_s17), 0  ;;  %s570_s18 = smov (!%p23_p0, %s25_s18), %s473_s15 }
   0x7   : > { %p157_p3 = pnand %p379_p1, %p156_p2  ;;  %p27_p4 = scmp.ge.s32.totalorder %s570_s18, 2 }
   0x8   : > { %p186_p5 = scmp.lt.s32.totalorder (!%p157_p3), %s465_s13, 1  ;;  %p188_p6 = scmp.lt.s32.totalorder (!%p157_p3), %s461_s12, 1 }
   0x9   : > { %s572_s18 = smov (%p27_p4, %s570_s18), 0  ;;  %160 = sbr.rel (%p157_p3) target bundleno = 217 (0xd9), region = 32 }
   0xe   : > { %v479_v0 = vmov 0.0   ;;  %vm480_vm0 = vmmov 0   ;;  %v204_v1 = vld [vmem:[%s561_s2] sm:$0xff]  ;;  %s574_s13 = smov (!%p186_p5, %s465_s13), 1  ;;  %v481_v2 = vmov 0   ;;  %s576_s12 = smov (!%p188_p6, %s461_s12), 1 }
   0xf   : > { %390 = vmatprep.subr.mxu0 %v479_v0  ;;  %392 = vmatprep.mubr.msk.f32.mxu0 %vm480_vm0, %v479_v0  ;;  %s380_s21 = sshll.u32 %s574_s13, 1  ;;  %vm214_vm1 = vcmask 1043456   ;;  %v203_v3 = vld [vmem:[%s560_s1] sm:$0xff]  ;;  %vm210_vm2 = vcmask 31744  }
  0x10   : > { %438 = vset.pattern.permute.xlu0 %v481_v2  ;;  %s191_s22 = sadd.s32 %s380_s21, %s576_s12 }
  0x11   : > { %207 = vperm.xlu0 %438, %v204_v1   ;;  %s381_s23 = sshll.u32 %s191_s22, 2  ;;  %s383_s29 = sshll.u32 %s191_s22, 3 }
  0x12   : > { %s193_s26 = scalar_lea.vmem %s559_s0, %s381_s23  ;;  %s201_s5 = scalar_lea.vmem %s562_s3, %s383_s29 }
  0x13   : > { %v202_v4 = vld [vmem:[%s193_s26] sm:$0xf] }
  0x14   : > { %391 = vmatpush3.msk.msra.mxu0 %vm214_vm1, %v202_v4 }
  0x15   : > { %393 = vmatmul.mubr.msk.f32.vlgmr.msra.gmra.mxu0 %vm210_vm2, %v203_v3 }
  0x8c   : > { %v208_v5 = vpop.permute.xlu0 %207 }
  0xd5   : > { %v284_v6 = vpop.f32.mrf.mxu0 }
  0xd6   : > { %v285_v7 = vadd.f32 %v284_v6, %v208_v5 }
  0xd7   : > { %v394_v8 = vpop.f32.mrf.mxu0 }
  0xd8   : > { %288 = vst [vmem:[%s201_s5] sm:$0xff] %v285_v7 }
  0xd9 PF: > { %s13_s16 = sadd.s32 1, %s477_s16   ;;  %s563_s12 = smov %s469_s14 }
  0xda   : > { %p10_p7 = scmp.ge.s32.totalorder %s13_s16, 6   ;;  %s564_s13 = smov %s473_s15 }
  0xdb   : > { %s565_s14 = smov %s568_s17  ;;  %s566_s15 = smov %s572_s18 }
  0xdc   :  { %12 = sbr.rel (!%p10_p7) target bundleno = 3 (0x3), region = 62 }

</bundles_post_ra>
